<compile_context>
chip_gen: v5e
topology: v5e:2x2
jax: 0.10.0
libtpu: 0.0.40
codegen_flags: <defaults>
</compile_context>

<pallas_src>
import jax
import jax.numpy as jnp
import numpy as np
from jax import lax
from jax.experimental import pallas as pl
from jax.experimental.pallas import tpu as pltpu


# ----------------------------- Pallas kernel --------------------------------
def _patch_embed_kernel(w_ref, b_ref, p_ref, o_ref):
    # w_ref: (C_out_pad, K_pad)   fused conv weight  (K = C_in * patch_size)
    # b_ref: (C_out_pad, 1)       bias column, float32
    # p_ref: (K_pad, TL)          per-batch im2col tile (lane-dense)
    # o_ref: (C_out_pad, TL)      output tile of the current batch element
    acc = jnp.dot(w_ref[...], p_ref[...], preferred_element_type=jnp.float32)
    o_ref[...] = (acc + b_ref[...]).astype(o_ref.dtype)


# ------------------------------- helpers -------------------------------------
def _round_up(v, m):
    return ((v + m - 1) // m) * m


def _pick_lane_tile(L_out, lane_tile):
    """Lane tile along L_out: full dim when it fits; otherwise a multiple of 128
    that (preferably) divides the 128-rounded extent, to avoid over-padding."""
    if L_out <= lane_tile:
        return L_out, L_out
    L128 = _round_up(L_out, 128)
    tl = lane_tile
    for cand in range(lane_tile, 511, -128):      # prefer exact divisors >= 512
        if L128 % cand == 0:
            tl = cand
            break
    return tl, _round_up(L_out, tl)


# ------------------------------ wrapper ---------------------------------------
def patch_emerging_forward(x, weight, bias, *, patch_size, stride,
                           lane_tile=1024, compute_dtype=None,
                           vmem_budget_bytes=24 * 1024 * 1024):
    """Conv1d(in_channels, out_channels, kernel_size=patch_size, stride=stride).

    x:      (N, C_in, L)
    weight: (C_out, C_in, patch_size)
    bias:   (C_out,)
    compute_dtype: matmul operand dtype (pass jnp.bfloat16 on v5e/v6e to halve
                   the HBM stream); accumulation is always float32.
    returns (N, C_out, L_out) with L_out = (L - patch_size) // stride + 1
    """
    N, C_in, L = x.shape
    C_out, C_in_w, P = weight.shape
    assert C_in_w == C_in and P == patch_size
    assert L >= patch_size, "sequence shorter than patch_size"
    assert lane_tile >= 128 and lane_tile % 128 == 0

    L_out = (L - patch_size) // stride + 1
    K = C_in * patch_size
    out_dtype = x.dtype
    cdt = np.dtype(compute_dtype) if compute_dtype is not None else np.dtype(out_dtype)

    sublane = 16 if cdt.itemsize == 2 else 8
    K_pad = _round_up(K, sublane)
    C_out_pad = _round_up(C_out, 8)

    # ---- lane tiling over L_out ---------------------------------------------
    tl, L_out_pad = _pick_lane_tile(L_out, lane_tile)

    # v7x has 2 TensorCores: make sure single-batch, medium/large inputs still
    # get >= 2 parallel grid steps (no-op for the common N >= 2 case).
    if N == 1 and L_out_pad == tl and L_out >= 256:
        tl = _round_up((L_out + 1) // 2, 128)
        L_out_pad = _round_up(L_out, tl)

    # VMEM working-set cap (v7x VMEM is 64 MiB, 32 MiB default scoped):
    #   resident weight + bias + 3x activation buffers + 2x output buffers.
    def _vmem_est(t):
        return (C_out_pad * K_pad * cdt.itemsize + C_out_pad * 4
                + 3 * K_pad * t * cdt.itemsize
                + 2 * C_out_pad * t * np.dtype(out_dtype).itemsize)

    while _vmem_est(tl) > vmem_budget_bytes and tl > 128:
        tl = max(128, (tl // 2) // 128 * 128)
        L_out_pad = _round_up(L_out, tl)
    n_t = L_out_pad // tl

    # ---- per-batch im2col slab (N, K, L_out): one rearrangement pass --------
    # slab[n, c*P + k, p] = x[n, c, p*stride + k]
    if stride == patch_size:
        # Non-overlapping patches: pure reshape + swap of the two minor dims.
        xr = x[:, :, :L_out * patch_size].reshape(N, C_in, L_out, patch_size)
        slab = jnp.swapaxes(xr, 2, 3).reshape(N, K, L_out)
    else:
        # TODO(synk): overlapping windows still materialize the im2col slab
        # (inflated by patch_size/stride); fusing the tap gather into the kernel
        # via strided VMEM loads would remove this remaining HBM pass.
        taps = [x[:, :, k::stride][:, :, :L_out] for k in range(patch_size)]
        slab = jnp.stack(taps, axis=2).reshape(N, K, L_out)

    slab = slab.astype(cdt)
    pad_k, pad_l = K_pad - K, L_out_pad - L_out
    if pad_k or pad_l:                 # fuses into the slab-construction fusion
        slab = jnp.pad(slab, ((0, 0), (0, pad_k), (0, pad_l)))

    # ---- fused weight / float32 bias (tiny; any rearrangement is free) ------
    w2 = jnp.asarray(weight).reshape(C_out, K).astype(cdt)
    b2 = jnp.asarray(bias).reshape(C_out, 1).astype(jnp.float32)
    if C_out_pad != C_out or pad_k:
        w2 = jnp.pad(w2, ((0, C_out_pad - C_out), (0, pad_k)))
    if C_out_pad != C_out:
        b2 = jnp.pad(b2, ((0, C_out_pad - C_out), (0, 0)))

    # ---- pallas_call ---------------------------------------------------------
    def _call(slab_spec):
        return pl.pallas_call(
            _patch_embed_kernel,
            out_shape=jax.ShapeDtypeStruct((N, C_out_pad, L_out_pad), out_dtype),
            grid=(N, n_t),
            in_specs=[
                pl.BlockSpec((C_out_pad, K_pad), lambda n, t: (0, 0)),   # weight (resident)
                pl.BlockSpec((C_out_pad, 1), lambda n, t: (0, 0)),       # bias   (resident)
                slab_spec,                                               # activations
            ],
            out_specs=pl.BlockSpec((None, C_out_pad, tl), lambda n, t: (n, 0, t)),
            compiler_params=pltpu.CompilerParams(
                dimension_semantics=("parallel", "parallel"),
                vmem_limit_bytes=32 * 1024 * 1024,
            ),
        )(w2, b2, slab)

    try:
        # Deeper pipelining on the streamed activation input (op is DMA-exposed).
        out_padded = _call(pl.BlockSpec((None, K_pad, tl), lambda n, t: (n, 0, t),
                                        pipeline_mode=pl.Buffered(3)))
    except Exception:
        # Fallback to default double-buffering if Buffered(3) is unsupported here.
        out_padded = _call(pl.BlockSpec((None, K_pad, tl), lambda n, t: (n, 0, t)))

    return out_padded[:, :C_out, :L_out]          # no-op when nothing was padded


# --------------------------- pure-JAX reference -------------------------------
def patch_emerging_reference(x, weight, bias, *, stride):
    out = lax.conv_general_dilated(
        x, weight, window_strides=(stride,), padding="VALID",
        dimension_numbers=("NCH", "OIH", "NCH"),
    )
    return out + bias[None, :, None]


# --------------------------------- main ---------------------------------------
if __name__ == "__main__":
    # Small shapes consistent with the module: batch=2, in_channels=4, L=16,
    # out_channels=8, patch_size=4, stride=4  ->  L_out = 4.
    N, C_in, L = 2, 4, 16
    C_out, patch_size, stride = 8, 4, 4

    key = jax.random.PRNGKey(0)
    kx, kw, kb = jax.random.split(key, 3)
    x = jax.random.normal(kx, (N, C_in, L), jnp.float32)
    weight = 0.1 * jax.random.normal(kw, (C_out, C_in, patch_size), jnp.float32)
    bias = 0.1 * jax.random.normal(kb, (C_out,), jnp.float32)

    out = patch_emerging_forward(
        x, weight, bias, patch_size=patch_size, stride=stride
    )
    out = jax.block_until_ready(out)

    ref = patch_emerging_reference(x, weight, bias, stride=stride)
    np.testing.assert_allclose(np.asarray(out), np.asarray(ref), atol=1e-4, rtol=1e-4)

    print("KERNEL_OK")
</pallas_src>

<mosaic_0001>
module attributes {stable_mosaic.version = 11 : i64} {
  func.func @_patch_embed_kernel(%arg0: i32, %arg1: i32, %arg2: memref<8x16xf32, #tpu.memory_space<vmem>>, %arg3: memref<8x1xf32, #tpu.memory_space<vmem>>, %arg4: memref<1x16x4xf32, #tpu.memory_space<vmem>>, %arg5: memref<1x8x4xf32, #tpu.memory_space<vmem>>) attributes {dimension_semantics = [#tpu.dimension_semantics<parallel>, #tpu.dimension_semantics<parallel>], iteration_bounds = array<i64: 2, 1>, scalar_prefetch = 0 : i64, scratch_operands = 0 : i64, tpu.core_type = #tpu.core_type<tc>, window_params = [{pipeline_mode = #tpu.pipeline_mode<synchronous>, transform_indices = @transform_0, window_bounds = array<i64: 8, 16>}, {pipeline_mode = #tpu.pipeline_mode<synchronous>, transform_indices = @transform_1, window_bounds = array<i64: 8, 1>}, {transform_indices = @transform_2, window_bounds = array<i64: 1, 16, 4>}, {transform_indices = @transform_3, window_bounds = array<i64: 1, 8, 4>}]} {
    %c0 = arith.constant 0 : index
    %c0_0 = arith.constant 0 : index
    %0 = vector.load %arg2[%c0, %c0_0] : memref<8x16xf32, #tpu.memory_space<vmem>>, vector<8x16xf32>
    %c0_1 = arith.constant 0 : index
    %c0_2 = arith.constant 0 : index
    %c0_3 = arith.constant 0 : index
    %1 = vector.load %arg4[%c0_1, %c0_2, %c0_3] : memref<1x16x4xf32, #tpu.memory_space<vmem>>, vector<1x16x4xf32>
    %2 = vector.shape_cast %1 : vector<1x16x4xf32> to vector<16x4xf32>
    %cst = arith.constant dense<0.000000e+00> : vector<8x4xf32>
    %3 = tpu.matmul %0, %2, %cst {dimension_numbers = #tpu.dot_dimension_numbers<[1], [0], [0], [1], [0, 0, 1, 1], [], []>} : vector<8x16xf32>, vector<16x4xf32>, vector<8x4xf32> -> vector<8x4xf32>
    %c0_4 = arith.constant 0 : index
    %c0_5 = arith.constant 0 : index
    %4 = vector.load %arg3[%c0_4, %c0_5] : memref<8x1xf32, #tpu.memory_space<vmem>>, vector<8x1xf32>
    %5 = vector.broadcast %4 : vector<8x1xf32> to vector<8x4xf32>
    %6 = arith.addf %3, %5 : vector<8x4xf32>
    %c0_6 = arith.constant 0 : index
    %c0_7 = arith.constant 0 : index
    %c0_8 = arith.constant 0 : index
    %7 = vector.load %arg5[%c0_6, %c0_7, %c0_8] : memref<1x8x4xf32, #tpu.memory_space<vmem>>, vector<1x8x4xf32>
    %8 = vector.shape_cast %7 : vector<1x8x4xf32> to vector<8x4xf32>
    %9 = vector.shape_cast %6 : vector<8x4xf32> to vector<1x8x4xf32>
    tpu.vector_store %arg5[%c0_6, %c0_7, %c0_8], %9 {strides = array<i32>} : memref<1x8x4xf32, #tpu.memory_space<vmem>>, vector<1x8x4xf32>,
    return
  }
  func.func @transform_0(%arg0: i32, %arg1: i32) -> (i32, i32) {
    %c0_i32 = arith.constant 0 : i32
    %c0_i32_0 = arith.constant 0 : i32
    %c0_i32_1 = arith.constant 0 : i32
    return %c0_i32, %c0_i32_0 : i32, i32
  }
  func.func @transform_1(%arg0: i32, %arg1: i32) -> (i32, i32) {
    %c0_i32 = arith.constant 0 : i32
    %c0_i32_0 = arith.constant 0 : i32
    %c0_i32_1 = arith.constant 0 : i32
    return %c0_i32, %c0_i32_0 : i32, i32
  }
  func.func @transform_2(%arg0: i32, %arg1: i32) -> (i32, i32, i32) {
    %c0_i32 = arith.constant 0 : i32
    %c0_i32_0 = arith.constant 0 : i32
    return %arg0, %c0_i32, %arg1 : i32, i32, i32
  }
  func.func @transform_3(%arg0: i32, %arg1: i32) -> (i32, i32, i32) {
    %c0_i32 = arith.constant 0 : i32
    %c0_i32_0 = arith.constant 0 : i32
    return %arg0, %c0_i32, %arg1 : i32, i32, i32
  }
}

</mosaic_0001>

<bundles_post_ra>
// kernel: tpu_custom_call.1
= control target key start
LH: loop header
LB: loop body
LE: loop exit
PB: predicated region body
PF: predicated region fallthrough
CT: control target
= control target key end

     0   :  { %s395_s12 = smov 0   ;;  %s397_s13 = smov 0   ;;  %s431_s0 = inlined_call_operand.vmem [shape: f32[8,16], index: 0, kind: input, shape index: {}]   ;;  %s432_s1 = inlined_call_operand.vmem [shape: f32[8,1], index: 1, kind: input, shape index: {}]   ;;  %s433_s2 = inlined_call_operand.vmem [shape: f32[2,16,4], index: 2, kind: input, shape index: {}]   ;;  %s434_s3 = inlined_call_operand.vmem [shape: f32[2,8,4], index: 3, kind: output, shape index: {}]  }
   0x1   :  { %s399_s14 = smov 0  }
   0x2 LB: > { %s25_s15 = sadd.s32 1, %s368_s13  ;;  %p316_p0 = scmp.ge.s32.totalorder %s372_s14, 1  ;;  %s372_s14 = sphi %s399_s14, %s13_s14   ;;  %s368_s13 = sphi %s397_s13, %s436_s13   ;;  %s364_s12 = sphi %s395_s12, %s435_s12  }
   0x3   : > { %p27_p1 = scmp.ge.s32.totalorder %s25_s15, 2  ;;  %p156_p2 = scmp.lt.s32.totalorder %s372_s14, 3 }
   0x5   : > { %s438_s15 = smov (%p27_p1, %s25_s15), 0  ;;  %p157_p3 = pnand %p316_p0, %p156_p2 }
   0x6   : > { %p185_p4 = scmp.lt.s32.totalorder (!%p157_p3), %s364_s12, 1 }
   0x7   : > { %160 = sbr.rel (%p157_p3) target bundleno = 148 (0x94), region = 32 }
   0xc   : > { %v203_v0 = vld [vmem:[%s432_s1] sm:$0xff]  ;;  %v374_v1 = vmov 0   ;;  %s440_s12 = smov (!%p185_p4, %s364_s12), 1  ;;  %vm209_vm0 = vcmask 130048   ;;  %vm233_vm1 = vcmask 31744  }
   0xd   : > { %349 = vset.pattern.permute.xlu0 %v374_v1  ;;  %s323_s18 = sshll.u32 %s440_s12, 4  ;;  %v200_v4 = vld [vmem:[%s431_s0] sm:$0xff]  ;;  %s319_s24 = sshll.u32 %s440_s12, 3 }
   0xe   : > { %206 = vperm.xlu0 %349, %v203_v0   ;;  %s192_s21 = scalar_lea.vmem %s433_s2, %s323_s18  ;;  %s199_s27 = scalar_lea.vmem %s434_s3, %s319_s24 }
   0xf   : > { %v202_v2 = vld [vmem:[%s192_s21 + $0x8] sm:$0xff]  ;;  %v201_v3 = vld [vmem:[%s192_s21] sm:$0xff] }
  0x10   : > { %227 = vmatpush.msra.mxu0 %v202_v2 }
  0x12   : > { %228 = vmatpush.msra.mxu0 %v201_v3 }
  0x13   : > { %320 = vmatmul.msk.f32.vlgmr.msra.gmra.mxu0 %vm209_vm0, %v200_v4 }
  0x80   : > { %v207_v5 = vpop.permute.xlu0 %206 }
  0x90   : > { %v230_v6 = vpop.f32.mrf.mxu0 }
  0x91   : > { %v231_v7 = vadd.f32 %v230_v6, %v207_v5 }
  0x93   : > { %234 = vst.msk [vmem:[%s199_s27] sm:$0xff] %vm233_vm1, %v231_v7 }
  0x94 PF: > { %s13_s14 = sadd.s32 1, %s372_s14   ;;  %s435_s12 = smov %s368_s13 }
  0x95   : > { %p10_p5 = scmp.ge.s32.totalorder %s13_s14, 4   ;;  %s436_s13 = smov %s438_s15 }
  0x97   :  { %12 = sbr.rel (!%p10_p5) target bundleno = 2 (0x2), region = 62 }

</bundles_post_ra>
